<compile_context>
chip_gen: v5e
topology: v5e:2x2
jax: 0.10.0
libtpu: 0.0.40
codegen_flags: <defaults>
</compile_context>

<pallas_src>
import jax
import jax.numpy as jnp
from jax import lax
from jax.experimental import pallas as pl
from jax.experimental.pallas import tpu as pltpu
from typing import NamedTuple


class PolicyOutput(NamedTuple):
    action_mean: jax.Array   # [B, action_space]   (Normal loc)
    sigma: jax.Array         # [action_space]      (Normal scale)
    value: jax.Array         # [B]                 (critic value, squeezed)


# ---------------------------------------------------------------------------
# Kernel: 3 fused matmuls (bf16 operands, f32 accumulation), transposed output.
# ---------------------------------------------------------------------------
def _make_policy_kernel(n_chunks):
    def _policy_kernel(x_ref, w1_ref, b1_ref, w2_ref, b2_ref, w3t_ref, b3_ref,
                       out_ref):
        tb = x_ref.shape[0]
        ch = tb // n_chunks

        # Hoist the (tiny) weight/bias loads out of the chunk loop.
        w1 = w1_ref[...]          # [S, 2H]  bf16
        b1 = b1_ref[...]          # [1, 2H]  f32
        w2 = w2_ref[...]          # [2H, 2H] bf16 (block-diagonal actor/critic)
        b2 = b2_ref[...]          # [1, 2H]  f32
        w3t = w3t_ref[...]        # [R, 2H]  bf16 (rows 0..A-1 actor, row A critic)
        b3 = b3_ref[...]          # [R, 1]   f32

        # Static unroll over sub-chunks: independent chains let the scheduler
        # overlap the EUP tanh of chunk i with the MXU matmuls of chunk i+1.
        for c in range(n_chunks):
            x = x_ref[pl.ds(c * ch, ch), :].astype(jnp.bfloat16)

            # Layer 1: [ch, S] @ [S, 2H] -> [ch, 2H] (actor | critic fused)
            h = jnp.tanh(jnp.dot(x, w1, preferred_element_type=jnp.float32) + b1)
            # Layer 2: block-diagonal [2H, 2H]
            h = jnp.tanh(jnp.dot(h.astype(jnp.bfloat16), w2,
                                 preferred_element_type=jnp.float32) + b2)
            # Layer 3 in transposed form: [R, 2H] x [ch, 2H]^T -> [R, ch]
            out_t = lax.dot_general(
                w3t, h.astype(jnp.bfloat16),
                dimension_numbers=(((1,), (1,)), ((), ())),
                preferred_element_type=jnp.float32) + b3

            out_ref[:, pl.ds(c * ch, ch)] = out_t.astype(out_ref.dtype)

    return _policy_kernel


# ---------------------------------------------------------------------------
# Init (matches the PyTorch module: weights ~ N(0,1), biases = 0, sigma = 0.5)
# ---------------------------------------------------------------------------
def init_policy_params(key, state_space, action_space, hidden=64,
                       dtype=jnp.float32):
    keys = jax.random.split(key, 6)

    def linear(k, fan_in, fan_out):
        # PyTorch stores weight as [out, in]; we keep the transposed [in, out].
        w = jax.random.normal(k, (fan_in, fan_out), dtype=dtype)
        b = jnp.zeros((1, fan_out), dtype=dtype)
        return w, b

    w1a, b1a = linear(keys[0], state_space, hidden)
    w2a, b2a = linear(keys[1], hidden, hidden)
    w3a, b3a = linear(keys[2], hidden, action_space)
    w1c, b1c = linear(keys[3], state_space, hidden)
    w2c, b2c = linear(keys[4], hidden, hidden)
    w3c, b3c = linear(keys[5], hidden, 1)
    sigma_param = jnp.full((action_space,), 0.5, dtype=dtype)
    return dict(w1a=w1a, b1a=b1a, w2a=w2a, b2a=b2a, w3a=w3a, b3a=b3a,
                w1c=w1c, b1c=b1c, w2c=w2c, b2c=b2c, w3c=w3c, b3c=b3c,
                sigma_param=sigma_param)


def pack_policy_params(params, compute_dtype=jnp.bfloat16):
    """One-time packing of actor+critic weights into fused, MXU-friendly
    (bf16) tensors.  Layer 3 is stored pre-transposed so the kernel can emit a
    lane-dense [R, B] output slab directly."""
    w1a, w1c = params["w1a"], params["w1c"]
    w2a, w2c = params["w2a"], params["w2c"]
    w3a, w3c = params["w3a"], params["w3c"]
    S, H = w1a.shape
    A = w3a.shape[1]
    H2 = 2 * H                                     # fused hidden width (=128)
    R = max(8, ((A + 1 + 7) // 8) * 8)             # sublane-padded output rows

    W1 = jnp.concatenate([w1a, w1c], axis=1).astype(compute_dtype)        # [S, 2H]
    b1 = jnp.concatenate([params["b1a"], params["b1c"]],
                         axis=1).astype(jnp.float32)                      # [1, 2H]

    W2 = jnp.zeros((H2, H2), jnp.float32)
    W2 = W2.at[:H, :H].set(w2a).at[H:, H:].set(w2c)                       # block-diag
    W2 = W2.astype(compute_dtype)
    b2 = jnp.concatenate([params["b2a"], params["b2c"]],
                         axis=1).astype(jnp.float32)                      # [1, 2H]

    # W3T: row p (< A) -> actor mean column p in the first H entries,
    #      row A     -> critic value weights in the last H entries.
    W3T = jnp.zeros((R, H2), jnp.float32)
    W3T = W3T.at[:A, :H].set(w3a.T).at[A, H:].set(w3c[:, 0])
    W3T = W3T.astype(compute_dtype)
    b3 = jnp.zeros((R, 1), jnp.float32)
    b3 = b3.at[:A, 0].set(params["b3a"][0]).at[A, 0].set(params["b3c"][0, 0])

    # sigma does not depend on x -> compute once here (numerically robust).
    # NOTE: re-pack after any update to sigma_param; forward-only (no VJP).
    sigma = jax.nn.softplus(params["sigma_param"].astype(jnp.float32))    # [A]

    return dict(W1=W1, b1=b1, W2=W2, b2=b2, W3T=W3T, b3=b3,
                sigma=sigma, action_space=A)


# ---------------------------------------------------------------------------
# Forward wrapper
# ---------------------------------------------------------------------------
def policy_forward(packed, x, *, max_batch_tile=1024):
    """Pallas forward pass. x: [B, state_space] float32; packed from
    pack_policy_params()."""
    B, S = x.shape
    H2 = packed["W1"].shape[1]
    R = packed["W3T"].shape[0]
    A = packed["action_space"]

    TB = B if B <= max_batch_tile else max_batch_tile     # sweep 1024-4096
    grid = (pl.cdiv(B, TB),)

    # Intra-tile chunking for MXU/EUP overlap (only worth it for big tiles).
    if TB % 512 == 0:
        n_chunks = 4
    elif TB % 256 == 0:
        n_chunks = 2
    else:
        n_chunks = 1

    const = lambda shape: pl.BlockSpec(shape, lambda i: (0, 0))
    in_specs = [
        pl.BlockSpec((TB, S), lambda i: (i, 0)),   # x tile
        const((S, H2)),                            # W1  (bf16)
        const((1, H2)),                            # b1  (f32)
        const((H2, H2)),                           # W2  (bf16)
        const((1, H2)),                            # b2  (f32)
        const((R, H2)),                            # W3T (bf16)
        const((R, 1)),                             # b3  (f32)
    ]
    out_spec = pl.BlockSpec((R, TB), lambda i: (0, i))

    slab = pl.pallas_call(
        _make_policy_kernel(n_chunks),
        grid=grid,
        in_specs=in_specs,
        out_specs=out_spec,
        out_shape=jax.ShapeDtypeStruct((R, B), jnp.float32),
        compiler_params=pltpu.CompilerParams(
            dimension_semantics=("parallel",)),
    )(x, packed["W1"], packed["b1"], packed["W2"], packed["b2"],
      packed["W3T"], packed["b3"])

    # The slab is only [R, B] (R=8) so these consumer-side slices are cheap;
    # large-batch pipelines can instead take `slab` directly and fuse.
    action_mean = slab[:A, :].T        # [B, A]
    value = slab[A, :]                 # [B]
    return PolicyOutput(action_mean=action_mean,
                        sigma=packed["sigma"],
                        value=value)


# ---------------------------------------------------------------------------
# References
# ---------------------------------------------------------------------------
def policy_forward_ref_f32(params, x):
    """Pure-f32 un-fused reference (matches PyTorch semantics exactly)."""
    ha = jnp.tanh(x @ params["w1a"] + params["b1a"])
    ha = jnp.tanh(ha @ params["w2a"] + params["b2a"])
    mean = ha @ params["w3a"] + params["b3a"]
    sigma = jax.nn.softplus(params["sigma_param"])
    hc = jnp.tanh(x @ params["w1c"] + params["b1c"])
    hc = jnp.tanh(hc @ params["w2c"] + params["b2c"])
    value = (hc @ params["w3c"] + params["b3c"])[:, 0]
    return mean, sigma, value


def policy_forward_ref_bf16(params, x):
    """Un-fused reference with the kernel's numerics (bf16 MXU operands,
    f32 accumulation, f32 bias/tanh)."""
    bf = jnp.bfloat16

    def lin(h, w, b):
        return jnp.dot(h.astype(bf), w.astype(bf),
                       preferred_element_type=jnp.float32) + b

    ha = jnp.tanh(lin(x, params["w1a"], params["b1a"]))
    ha = jnp.tanh(lin(ha, params["w2a"], params["b2a"]))
    mean = lin(ha, params["w3a"], params["b3a"])
    hc = jnp.tanh(lin(x, params["w1c"], params["b1c"]))
    hc = jnp.tanh(lin(hc, params["w2c"], params["b2c"]))
    value = lin(hc, params["w3c"], params["b3c"])[:, 0]
    sigma = jax.nn.softplus(params["sigma_param"])
    return mean, sigma, value


if __name__ == "__main__":
    key = jax.random.PRNGKey(0)
    k_param, k_x = jax.random.split(key)

    batch = 8
    state_space = 16
    action_space = 4

    params = init_policy_params(k_param, state_space, action_space, hidden=64)
    packed = pack_policy_params(params)
    x = jax.random.normal(k_x, (batch, state_space), dtype=jnp.float32)

    out = policy_forward(packed, x)
    jax.block_until_ready(out)

    assert out.action_mean.shape == (batch, action_space)
    assert out.sigma.shape == (action_space,)
    assert out.value.shape == (batch,)

    # (1) Tight check vs. a reference with the kernel's exact numerics
    #     (validates the fused / block-diag / transposed-output layout).
    m_bf, s_bf, v_bf = policy_forward_ref_bf16(params, x)
    assert jnp.allclose(out.action_mean, m_bf, atol=1e-3, rtol=1e-3)
    assert jnp.allclose(out.value, v_bf, atol=1e-3, rtol=1e-3)
    assert jnp.allclose(out.sigma, s_bf, atol=1e-6, rtol=1e-6)

    # (2) Loose sanity check vs. the pure-f32 (PyTorch-equivalent) reference;
    #     bf16 operand rounding perturbs results slightly.
    m_f32, s_f32, v_f32 = policy_forward_ref_f32(params, x)
    assert jnp.allclose(out.action_mean, m_f32, atol=0.5, rtol=0.05)
    assert jnp.allclose(out.value, v_f32, atol=0.5, rtol=0.05)
    assert jnp.allclose(out.sigma, s_f32, atol=1e-6, rtol=1e-6)

    # TODO(synk): torch.distributions.Normal has no Pallas equivalent; we
    # return its (loc, scale) parameters instead.
    print("KERNEL_OK")
</pallas_src>

<mosaic_0001>
module attributes {stable_mosaic.version = 11 : i64} {
  func.func @_policy_kernel(%arg0: i32, %arg1: memref<8x16xf32, #tpu.memory_space<vmem>>, %arg2: memref<16x128xbf16, #tpu.memory_space<vmem>>, %arg3: memref<1x128xf32, #tpu.memory_space<vmem>>, %arg4: memref<128x128xbf16, #tpu.memory_space<vmem>>, %arg5: memref<1x128xf32, #tpu.memory_space<vmem>>, %arg6: memref<8x128xbf16, #tpu.memory_space<vmem>>, %arg7: memref<8x1xf32, #tpu.memory_space<vmem>>, %arg8: memref<8x8xf32, #tpu.memory_space<vmem>>) attributes {dimension_semantics = [#tpu.dimension_semantics<parallel>], iteration_bounds = array<i64: 1>, scalar_prefetch = 0 : i64, scratch_operands = 0 : i64, tpu.core_type = #tpu.core_type<tc>, window_params = [{transform_indices = @transform_0, window_bounds = array<i64: 8, 16>}, {pipeline_mode = #tpu.pipeline_mode<synchronous>, transform_indices = @transform_1, window_bounds = array<i64: 16, 128>}, {pipeline_mode = #tpu.pipeline_mode<synchronous>, transform_indices = @transform_2, window_bounds = array<i64: 1, 128>}, {pipeline_mode = #tpu.pipeline_mode<synchronous>, transform_indices = @transform_3, window_bounds = array<i64: 128, 128>}, {pipeline_mode = #tpu.pipeline_mode<synchronous>, transform_indices = @transform_4, window_bounds = array<i64: 1, 128>}, {pipeline_mode = #tpu.pipeline_mode<synchronous>, transform_indices = @transform_5, window_bounds = array<i64: 8, 128>}, {pipeline_mode = #tpu.pipeline_mode<synchronous>, transform_indices = @transform_6, window_bounds = array<i64: 8, 1>}, {transform_indices = @transform_7, window_bounds = array<i64: 8, 8>}]} {
    %c0 = arith.constant 0 : index
    %c0_0 = arith.constant 0 : index
    %0 = vector.load %arg2[%c0, %c0_0] : memref<16x128xbf16, #tpu.memory_space<vmem>>, vector<16x128xbf16>
    %c0_1 = arith.constant 0 : index
    %c0_2 = arith.constant 0 : index
    %1 = vector.load %arg3[%c0_1, %c0_2] : memref<1x128xf32, #tpu.memory_space<vmem>>, vector<1x128xf32>
    %c0_3 = arith.constant 0 : index
    %c0_4 = arith.constant 0 : index
    %2 = vector.load %arg4[%c0_3, %c0_4] : memref<128x128xbf16, #tpu.memory_space<vmem>>, vector<128x128xbf16>
    %c0_5 = arith.constant 0 : index
    %c0_6 = arith.constant 0 : index
    %3 = vector.load %arg5[%c0_5, %c0_6] : memref<1x128xf32, #tpu.memory_space<vmem>>, vector<1x128xf32>
    %c0_7 = arith.constant 0 : index
    %c0_8 = arith.constant 0 : index
    %4 = vector.load %arg6[%c0_7, %c0_8] : memref<8x128xbf16, #tpu.memory_space<vmem>>, vector<8x128xbf16>
    %c0_9 = arith.constant 0 : index
    %c0_10 = arith.constant 0 : index
    %5 = vector.load %arg7[%c0_9, %c0_10] : memref<8x1xf32, #tpu.memory_space<vmem>>, vector<8x1xf32>
    %c0_11 = arith.constant 0 : index
    %c0_12 = arith.constant 0 : index
    %6 = vector.load %arg1[%c0_11, %c0_12] : memref<8x16xf32, #tpu.memory_space<vmem>>, vector<8x16xf32>
    %7 = arith.truncf %6 : vector<8x16xf32> to vector<8x16xbf16>
    %cst = arith.constant dense<0.000000e+00> : vector<8x128xf32>
    %8 = tpu.matmul %7, %0, %cst {dimension_numbers = #tpu.dot_dimension_numbers<[1], [0], [0], [1], [0, 0, 1, 1], [], []>} : vector<8x16xbf16>, vector<16x128xbf16>, vector<8x128xf32> -> vector<8x128xf32>
    %9 = vector.broadcast %1 : vector<1x128xf32> to vector<8x128xf32>
    %10 = arith.addf %8, %9 : vector<8x128xf32>
    %11 = math.tanh %10 : vector<8x128xf32>
    %12 = arith.truncf %11 : vector<8x128xf32> to vector<8x128xbf16>
    %cst_13 = arith.constant dense<0.000000e+00> : vector<8x128xf32>
    %13 = tpu.matmul %12, %2, %cst_13 {dimension_numbers = #tpu.dot_dimension_numbers<[1], [0], [0], [1], [0, 0, 1, 1], [], []>} : vector<8x128xbf16>, vector<128x128xbf16>, vector<8x128xf32> -> vector<8x128xf32>
    %14 = vector.broadcast %3 : vector<1x128xf32> to vector<8x128xf32>
    %15 = arith.addf %13, %14 : vector<8x128xf32>
    %16 = math.tanh %15 : vector<8x128xf32>
    %17 = arith.truncf %16 : vector<8x128xf32> to vector<8x128xbf16>
    %cst_14 = arith.constant dense<0.000000e+00> : vector<8x8xf32>
    %18 = tpu.matmul %4, %17, %cst_14 {dimension_numbers = #tpu.dot_dimension_numbers<[1], [1], [0], [0], [0, 0, 1, 0], [], []>} : vector<8x128xbf16>, vector<8x128xbf16>, vector<8x8xf32> -> vector<8x8xf32>
    %19 = vector.broadcast %5 : vector<8x1xf32> to vector<8x8xf32>
    %20 = arith.addf %18, %19 : vector<8x8xf32>
    %c0_15 = arith.constant 0 : index
    %c0_16 = arith.constant 0 : index
    %21 = vector.load %arg8[%c0_15, %c0_16] : memref<8x8xf32, #tpu.memory_space<vmem>>, vector<8x8xf32>
    tpu.vector_store %arg8[%c0_15, %c0_16], %20 {strides = array<i32>} : memref<8x8xf32, #tpu.memory_space<vmem>>, vector<8x8xf32>,
    return
  }
  func.func @transform_0(%arg0: i32) -> (i32, i32) {
    %c0_i32 = arith.constant 0 : i32
    %c0_i32_0 = arith.constant 0 : i32
    return %arg0, %c0_i32 : i32, i32
  }
  func.func @transform_1(%arg0: i32) -> (i32, i32) {
    %c0_i32 = arith.constant 0 : i32
    %c0_i32_0 = arith.constant 0 : i32
    %c0_i32_1 = arith.constant 0 : i32
    return %c0_i32, %c0_i32_0 : i32, i32
  }
  func.func @transform_2(%arg0: i32) -> (i32, i32) {
    %c0_i32 = arith.constant 0 : i32
    %c0_i32_0 = arith.constant 0 : i32
    %c0_i32_1 = arith.constant 0 : i32
    return %c0_i32, %c0_i32_0 : i32, i32
  }
  func.func @transform_3(%arg0: i32) -> (i32, i32) {
    %c0_i32 = arith.constant 0 : i32
    %c0_i32_0 = arith.constant 0 : i32
    %c0_i32_1 = arith.constant 0 : i32
    return %c0_i32, %c0_i32_0 : i32, i32
  }
  func.func @transform_4(%arg0: i32) -> (i32, i32) {
    %c0_i32 = arith.constant 0 : i32
    %c0_i32_0 = arith.constant 0 : i32
    %c0_i32_1 = arith.constant 0 : i32
    return %c0_i32, %c0_i32_0 : i32, i32
  }
  func.func @transform_5(%arg0: i32) -> (i32, i32) {
    %c0_i32 = arith.constant 0 : i32
    %c0_i32_0 = arith.constant 0 : i32
    %c0_i32_1 = arith.constant 0 : i32
    return %c0_i32, %c0_i32_0 : i32, i32
  }
  func.func @transform_6(%arg0: i32) -> (i32, i32) {
    %c0_i32 = arith.constant 0 : i32
    %c0_i32_0 = arith.constant 0 : i32
    %c0_i32_1 = arith.constant 0 : i32
    return %c0_i32, %c0_i32_0 : i32, i32
  }
  func.func @transform_7(%arg0: i32) -> (i32, i32) {
    %c0_i32 = arith.constant 0 : i32
    %c0_i32_0 = arith.constant 0 : i32
    return %c0_i32, %arg0 : i32, i32
  }
}

</mosaic_0001>

<bundles_post_ra>
// kernel: tpu_custom_call.1
= control target key start
LH: loop header
LB: loop body
LE: loop exit
PB: predicated region body
PF: predicated region fallthrough
CT: control target
= control target key end

     0   :  { %12 = vsyncpa [#allocation3], 0  ;;  %s462_s0 = inlined_call_operand.vmem [shape: f32[8,16], index: 0, kind: input, shape index: {}]   ;;  %s463_s1 = inlined_call_operand.hbm [shape: bf16[16,128], index: 1, kind: input, shape index: {}]   ;;  %s464_s2 = inlined_call_operand.vmem [shape: f32[1,128], index: 2, kind: input, shape index: {}]   ;;  %s465_s3 = inlined_call_operand.hbm [shape: bf16[128,128], index: 3, kind: input, shape index: {}]   ;;  %s466_s4 = inlined_call_operand.vmem [shape: f32[1,128], index: 4, kind: input, shape index: {}]   ;;  %s467_s5 = inlined_call_operand.hbm [shape: bf16[8,128], index: 5, kind: input, shape index: {}]   ;;  %s468_s6 = inlined_call_operand.vmem [shape: f32[8,1], index: 6, kind: input, shape index: {}]   ;;  %s469_s7 = inlined_call_operand.hbm [shape: f32[8,8], index: 7, kind: output, shape index: {}]  }
   0x1   :  { %13 = vsyncpa [#allocation6], 0 }
   0x2   :  { %14 = vsyncpa [#allocation4], 0  ;;  %s36_s26 = sshll.u32 %s465_s3, 4  ;;  %s391_s27 = smov [#allocation5]   ;;  %s37_s26 = int_to_ptr.hbm [resolvable:$true] %s36_s26 }
   0x3   :  { %s38_s28 = sshll.u32 %s391_s27, 4  ;;  %s21_s8 = sshll.u32 %s463_s1, 4  ;;  %s39_s28 = int_to_ptr.vmem [resolvable:$true] %s38_s28  ;;  %s22_s8 = int_to_ptr.hbm [resolvable:$true] %s21_s8 }
   0x4   :  { %s392_s9 = smov 64   ;;  %s393_s10 = smov 4  }
   0x5   :  { %44 = dma.hbm_to_vmem [thread:$0]  %s37_s26, 1024, %s39_s28, [#allocation6], %s392_s9, %s392_s9, %s393_s10  }
   0x6   :  { %s394_s11 = smov [#allocation2]   ;;  %s52_s15 = sshll.u32 %s467_s5, 4  ;;  %s53_s15 = int_to_ptr.hbm [resolvable:$true] %s52_s15 }
   0x7   :  { %s23_s12 = sshll.u32 %s394_s11, 4  ;;  %s395_s3 = smov [#allocation7]   ;;  %s24_s12 = int_to_ptr.vmem [resolvable:$true] %s23_s12 }
   0x8   :  { %29 = dma.hbm_to_vmem [thread:$0]  %s22_s8, 128, %s24_s12, [#allocation3], %s392_s9, %s392_s9, %s393_s10  }
   0x9   :  { %s54_s16 = sshll.u32 %s395_s3, 4  ;;  %s55_s16 = int_to_ptr.vmem [resolvable:$true] %s54_s16 }
   0xa   :  { %57 = dma.hbm_to_vmem [thread:$0]  %s53_s15, 64, %s55_s16, [#allocation6]  }
   0xb   :  { %385 = dma.done.wait [#allocation3], 128  }
   0xc   :  { %386 = vsyncadd [#allocation3], 4294967168 }
   0xd   :  { %387 = dma.done.wait [#allocation6], 1088  }
   0xe   :  { %388 = vsyncadd [#allocation6], 4294966208  ;;  %v266_v0 = vld [vmem:[#allocation2] sm:$0xff]  ;;  %vm106_vm0 = vcmask 130048   ;;  %v273_v4 = vld [vmem:[#allocation5 + $0x30] sm:$0xff]  ;;  %v396_v18 = vmov 0  }
   0xf   :  { %v95_v1 = vld [vmem:[%s462_s0] sm:$0xff]  ;;  %117 = vmatpush.bf16.msra.mxu0 %v266_v0  ;;  %v272_v5 = vld [vmem:[#allocation5 + $0x28] sm:$0xff]  ;;  %v271_v6 = vld [vmem:[#allocation5 + $0x20] sm:$0xff]  ;;  %282 = vset.pattern.permute.xlu0 %v396_v18  ;;  %s218_s24 = sshll.u32 %s469_s7, 4  ;;  %vm209_vm1 = vcmask 64512   ;;  %s219_s24 = int_to_ptr.hbm [resolvable:$true] %s218_s24 }
  0x10   :  { %v274_v2 = vld [vmem:[#allocation5 + $0x38] sm:$0xff]  ;;  %v96_v3 = vpack.c.bf16 %v95_v1, %v95_v1  ;;  %v269_v8 = vld [vmem:[#allocation5 + $0x10] sm:$0xff]  ;;  %v268_v9 = vld [vmem:[#allocation5 + $0x8] sm:$0xff] }
  0x11   :  { %176 = vmatpush.bf16.msra.mxu1 %v274_v2  ;;  %v270_v7 = vld [vmem:[#allocation5 + $0x18] sm:$0xff]  ;;  %v267_v10 = vld [vmem:[#allocation5] sm:$0xff] }
  0x12   :  { %233 = vmatmul.msk.bf16.vlgmr.msra.gmra.mxu0 %vm106_vm0, %v96_v3  ;;  %v283_v11 = vld [vmem:[%s464_s2] ss:$0 sm:$0xff]  ;;  %v93_v25 = vld [vmem:[#allocation7] sm:$0xf]  ;;  %s397_s2 = smov [#allocation8]  }
  0x13   :  { %v94_v17 = vld [vmem:[%s468_s6] sm:$0xff]  ;;  %s216_s22 = sshll.u32 %s397_s2, 4  ;;  %s217_s22 = int_to_ptr.vmem [resolvable:$true] %s216_s22 }
  0x14   :  { %193 = vperm.xlu0 %282, %v94_v17   ;;  %v284_v19 = vld [vmem:[%s466_s4] ss:$0 sm:$0xff] }
  0x15   :  { %177 = vmatpush.bf16.msra.mxu1 %v273_v4 }
  0x19   :  { %178 = vmatpush.bf16.msra.mxu1 %v272_v5 }
  0x1d   :  { %179 = vmatpush.bf16.msra.mxu1 %v271_v6 }
  0x21   :  { %180 = vmatpush.bf16.msra.mxu1 %v270_v7 }
  0x25   :  { %181 = vmatpush.bf16.msra.mxu1 %v269_v8 }
  0x29   :  { %182 = vmatpush.bf16.msra.mxu1 %v268_v9 }
  0x2d   :  { %183 = vmatpush.bf16.msra.mxu1 %v267_v10 }
  0x86   :  { %v194_v26 = vpop.permute.xlu0 %193 }
  0x8f   :  { %v119_v12 = vpop.f32.mrf.mxu0 }
  0x90   :  { %v120_v13 = vadd.f32 %v283_v11, %v119_v12 }
  0x92   :  { %285 = vtanh.f32 %v120_v13 }
  0x97   :  { %v121_v14 = vpop.f32.mrf.mxu0 }
  0x98   :  { %v286_v15 = vpop.eup %285 }
  0x99   :  { %v124_v16 = vpack.c.bf16 %v286_v15, %v286_v15 }
  0x9b   :  { %184 = vmatmul.bf16.vlgmr.msra.gmra.mxu1 %v124_v16 }
 0x118   :  { %v185_v20 = vpop.f32.mrf.mxu1 }
 0x119   :  { %v186_v21 = vadd.f32 %v284_v19, %v185_v20 }
 0x11b   :  { %287 = vtanh.f32 %v186_v21 }
 0x120   :  { %v187_v22 = vpop.f32.mrf.mxu1 }
 0x121   :  { %v288_v23 = vpop.eup %287 }
 0x122   :  { %v190_v24 = vpack.c.bf16 %v288_v23, %v288_v23 }
 0x124   :  { %203 = vmatpush.bf16.xpose.msra.mxu2 %v190_v24 }
 0x12b   :  { %204 = vmatmul.bf16.vlgmr.msra.gmra.mxu2 %v93_v25 }
 0x1ae   :  { %v205_v27 = vpop.f32.mrf.mxu2 }
 0x1af   :  { %v206_v28 = vadd.f32 %v205_v27, %v194_v26 }
 0x1b1   :  { %210 = vst.msk [vmem:[#allocation8] sm:$0xff] %vm209_vm1, %v206_v28 }
 0x1b2   :  { %221 = dma.vmem_to_hbm [thread:$0]  %s217_s22, 128, %s219_s24, [#allocation4]  }
 0x1b6   :  { %v207_v29 = vpop.f32.mrf.mxu2 }
 0x1b7   :  { %389 = dma.done.wait [#allocation4], 128  }
 0x1b8   :  { %390 = vsyncadd [#allocation4], 4294967168 }
 0x1b9   :  { %226 = vsyncpa [#allocation3], 1 }
 0x1ba   :  { %227 = vsyncpa [#allocation6], 1 }
 0x1bb   :  { %228 = vsyncpa [#allocation4], 1 }

</bundles_post_ra>
